<compile_context>
chip_gen: v5e
topology: v5e:2x2
jax: 0.10.0
libtpu: 0.0.40
codegen_flags: <defaults>
</compile_context>

<pallas_src>
import jax
import jax.numpy as jnp
from jax.experimental import pallas as pl
from jax.experimental.pallas import tpu as pltpu


def _round_up(x, m):
    return ((x + m - 1) // m) * m


def mlp_kernel(x_ref, w1_ref, b1_ref, w2_ref, b2_ref, o_ref):
    x = x_ref[...]                                  # (tb, 4)   f32
    w1 = w1_ref[...]                                # (4, 256)  f32

    # fc1 (K=4) on the VPU: 4 f32 broadcast-multiply-adds instead of a padded
    # MXU contraction.  (tb,1)*(1,256) broadcasts -> (tb, 256).
    h = x[:, 0:1] * w1[0:1, :]
    h = h + x[:, 1:2] * w1[1:2, :]
    h = h + x[:, 2:3] * w1[2:3, :]
    h = h + x[:, 3:4] * w1[3:4, :]
    h = h + b1_ref[...]                             # (1, 256) f32 bias
    h = jnp.maximum(h, 0.0)

    # fc2 (K=256) on the MXU: bf16 inputs, f32 accumulation.  w2 is lane-dense
    # (256, 128) with only the first 2 columns nonzero; store just those 2.
    out = jnp.dot(h.astype(jnp.bfloat16), w2_ref[...],
                  preferred_element_type=jnp.float32)   # (tb, 128) f32
    out_dim = o_ref.shape[-1]
    o_ref[...] = (out[:, :out_dim] + b2_ref[...]).astype(o_ref.dtype)


def prepare_params(w1, b1, w2, b2):
    """One-time preprocessing of the Linear weights (do NOT redo per call)."""
    hid, out_dim = w2.shape
    out_pad = _round_up(out_dim, 128)               # lane-dense MXU operand
    w1_f = w1.astype(jnp.float32)
    b1_f = jnp.reshape(b1, (1, hid)).astype(jnp.float32)
    w2_pad = jnp.zeros((hid, out_pad), jnp.bfloat16).at[:, :out_dim].set(
        w2.astype(jnp.bfloat16))
    b2_f = jnp.reshape(b2, (1, out_dim)).astype(jnp.float32)
    return w1_f, b1_f, w2_pad, b2_f


def mlp_forward(x, w1, b1, w2_pad, b2, *, tile_b=4096):
    """x:(B,4) f32; params from prepare_params() -> (B,2) f32."""
    B, in_dim = x.shape
    hid = w1.shape[1]
    out_pad = w2_pad.shape[1]
    out_dim = b2.shape[1]

    # Batch tile: multiple of 8 (f32 sublane); cap so the grid has >=2 steps
    # when the batch allows it (v7x: shard across both TensorCores).
    tb = min(tile_b, _round_up(max(-(-B // 2), 1), 8))
    tb = max(8, tb)
    b_pad = _round_up(B, tb)
    x_in = x if b_pad == B else jnp.pad(x, ((0, b_pad - B), (0, 0)))

    out = pl.pallas_call(
        mlp_kernel,
        out_shape=jax.ShapeDtypeStruct((b_pad, out_dim), jnp.float32),
        grid=(b_pad // tb,),
        in_specs=[
            pl.BlockSpec((tb, in_dim), lambda i: (i, 0)),     # streamed x tile (f32)
            pl.BlockSpec((in_dim, hid), lambda i: (0, 0)),    # resident w1 (f32)
            pl.BlockSpec((1, hid), lambda i: (0, 0)),         # resident b1 (f32)
            pl.BlockSpec((hid, out_pad), lambda i: (0, 0)),   # resident w2 (bf16, padded)
            pl.BlockSpec((1, out_dim), lambda i: (0, 0)),     # resident b2 (f32)
        ],
        out_specs=pl.BlockSpec((tb, out_dim), lambda i: (i, 0)),
        compiler_params=pltpu.CompilerParams(
            dimension_semantics=("parallel",),
        ),
    )(x_in, w1, b1, w2_pad, b2)

    return out if b_pad == B else out[:B]


def init_params(key):
    # nn.Linear default init: U(-1/sqrt(fan_in), 1/sqrt(fan_in)).
    k1, k2, k3, k4 = jax.random.split(key, 4)
    in1, hid, out = 4, 256, 2
    bound1 = 1.0 / jnp.sqrt(in1)
    bound2 = 1.0 / jnp.sqrt(hid)
    w1 = jax.random.uniform(k1, (in1, hid), jnp.float32, -bound1, bound1)
    b1 = jax.random.uniform(k2, (1, hid), jnp.float32, -bound1, bound1)
    w2 = jax.random.uniform(k3, (hid, out), jnp.float32, -bound2, bound2)
    b2 = jax.random.uniform(k4, (1, out), jnp.float32, -bound2, bound2)
    return w1, b1, w2, b2


if __name__ == "__main__":
    key = jax.random.PRNGKey(0)
    pkey, xkey = jax.random.split(key)
    w1, b1, w2, b2 = init_params(pkey)
    w1_p, b1_p, w2_pad, b2_p = prepare_params(w1, b1, w2, b2)  # once, not per call

    batch = 8
    x = jax.random.normal(xkey, (batch, 4), jnp.float32)

    y = mlp_forward(x, w1_p, b1_p, w2_pad, b2_p)
    y = jax.block_until_ready(y)
    assert y.shape == (batch, 2)

    hp = jax.lax.Precision.HIGHEST
    # Reference 1 (tight): exact f32 fc1, then fc2 with the same bf16-quantized
    # operands the kernel uses, f32 accumulation.
    h_ref = jnp.maximum(jnp.dot(x, w1, precision=hp) + b1, 0.0)
    ref_q = jnp.dot(h_ref.astype(jnp.bfloat16).astype(jnp.float32),
                    w2.astype(jnp.bfloat16).astype(jnp.float32),
                    precision=hp) + b2
    assert jnp.allclose(y, ref_q, atol=1e-3, rtol=1e-3)

    # Reference 2 (loose): pure f32 PyTorch-equivalent forward (fc2 is bf16 MXU).
    ref_f32 = jnp.dot(h_ref, w2, precision=hp) + b2
    assert jnp.allclose(y, ref_f32, atol=3e-2, rtol=3e-2)

    print("KERNEL_OK")
</pallas_src>

<mosaic_0001>
module attributes {stable_mosaic.version = 11 : i64} {
  func.func @mlp_kernel(%arg0: i32, %arg1: memref<8x4xf32, #tpu.memory_space<vmem>>, %arg2: memref<4x256xf32, #tpu.memory_space<vmem>>, %arg3: memref<1x256xf32, #tpu.memory_space<vmem>>, %arg4: memref<256x128xbf16, #tpu.memory_space<vmem>>, %arg5: memref<1x2xf32, #tpu.memory_space<vmem>>, %arg6: memref<8x2xf32, #tpu.memory_space<vmem>>) attributes {dimension_semantics = [#tpu.dimension_semantics<parallel>], iteration_bounds = array<i64: 1>, scalar_prefetch = 0 : i64, scratch_operands = 0 : i64, tpu.core_type = #tpu.core_type<tc>, window_params = [{transform_indices = @transform_0, window_bounds = array<i64: 8, 4>}, {pipeline_mode = #tpu.pipeline_mode<synchronous>, transform_indices = @transform_1, window_bounds = array<i64: 4, 256>}, {pipeline_mode = #tpu.pipeline_mode<synchronous>, transform_indices = @transform_2, window_bounds = array<i64: 1, 256>}, {pipeline_mode = #tpu.pipeline_mode<synchronous>, transform_indices = @transform_3, window_bounds = array<i64: 256, 128>}, {pipeline_mode = #tpu.pipeline_mode<synchronous>, transform_indices = @transform_4, window_bounds = array<i64: 1, 2>}, {transform_indices = @transform_5, window_bounds = array<i64: 8, 2>}]} {
    %c0 = arith.constant 0 : index
    %c0_0 = arith.constant 0 : index
    %0 = vector.load %arg1[%c0, %c0_0] : memref<8x4xf32, #tpu.memory_space<vmem>>, vector<8x4xf32>
    %c0_1 = arith.constant 0 : index
    %c0_2 = arith.constant 0 : index
    %1 = vector.load %arg2[%c0_1, %c0_2] : memref<4x256xf32, #tpu.memory_space<vmem>>, vector<4x256xf32>
    %2 = vector.extract_strided_slice %0 {offsets = [0, 0], sizes = [8, 1], strides = [1, 1]} : vector<8x4xf32> to vector<8x1xf32>
    %3 = vector.extract_strided_slice %1 {offsets = [0, 0], sizes = [1, 256], strides = [1, 1]} : vector<4x256xf32> to vector<1x256xf32>
    %4 = vector.broadcast %2 : vector<8x1xf32> to vector<8x256xf32>
    %5 = vector.broadcast %3 : vector<1x256xf32> to vector<8x256xf32>
    %6 = arith.mulf %4, %5 : vector<8x256xf32>
    %7 = vector.extract_strided_slice %0 {offsets = [0, 1], sizes = [8, 1], strides = [1, 1]} : vector<8x4xf32> to vector<8x1xf32>
    %8 = vector.extract_strided_slice %1 {offsets = [1, 0], sizes = [1, 256], strides = [1, 1]} : vector<4x256xf32> to vector<1x256xf32>
    %9 = vector.broadcast %7 : vector<8x1xf32> to vector<8x256xf32>
    %10 = vector.broadcast %8 : vector<1x256xf32> to vector<8x256xf32>
    %11 = arith.mulf %9, %10 : vector<8x256xf32>
    %12 = arith.addf %6, %11 : vector<8x256xf32>
    %13 = vector.extract_strided_slice %0 {offsets = [0, 2], sizes = [8, 1], strides = [1, 1]} : vector<8x4xf32> to vector<8x1xf32>
    %14 = vector.extract_strided_slice %1 {offsets = [2, 0], sizes = [1, 256], strides = [1, 1]} : vector<4x256xf32> to vector<1x256xf32>
    %15 = vector.broadcast %13 : vector<8x1xf32> to vector<8x256xf32>
    %16 = vector.broadcast %14 : vector<1x256xf32> to vector<8x256xf32>
    %17 = arith.mulf %15, %16 : vector<8x256xf32>
    %18 = arith.addf %12, %17 : vector<8x256xf32>
    %19 = vector.extract_strided_slice %0 {offsets = [0, 3], sizes = [8, 1], strides = [1, 1]} : vector<8x4xf32> to vector<8x1xf32>
    %20 = vector.extract_strided_slice %1 {offsets = [3, 0], sizes = [1, 256], strides = [1, 1]} : vector<4x256xf32> to vector<1x256xf32>
    %21 = vector.broadcast %19 : vector<8x1xf32> to vector<8x256xf32>
    %22 = vector.broadcast %20 : vector<1x256xf32> to vector<8x256xf32>
    %23 = arith.mulf %21, %22 : vector<8x256xf32>
    %24 = arith.addf %18, %23 : vector<8x256xf32>
    %c0_3 = arith.constant 0 : index
    %c0_4 = arith.constant 0 : index
    %25 = vector.load %arg3[%c0_3, %c0_4] : memref<1x256xf32, #tpu.memory_space<vmem>>, vector<1x256xf32>
    %26 = vector.broadcast %25 : vector<1x256xf32> to vector<8x256xf32>
    %27 = arith.addf %24, %26 : vector<8x256xf32>
    %cst = arith.constant 0.000000e+00 : f32
    %28 = vector.broadcast %cst : f32 to vector<8x256xf32>
    %29 = arith.maximumf %27, %28 : vector<8x256xf32>
    %30 = arith.truncf %29 : vector<8x256xf32> to vector<8x256xbf16>
    %c0_5 = arith.constant 0 : index
    %c0_6 = arith.constant 0 : index
    %31 = vector.load %arg4[%c0_5, %c0_6] : memref<256x128xbf16, #tpu.memory_space<vmem>>, vector<256x128xbf16>
    %cst_7 = arith.constant dense<0.000000e+00> : vector<8x128xf32>
    %32 = tpu.matmul %30, %31, %cst_7 {dimension_numbers = #tpu.dot_dimension_numbers<[1], [0], [0], [1], [0, 0, 1, 1], [], []>} : vector<8x256xbf16>, vector<256x128xbf16>, vector<8x128xf32> -> vector<8x128xf32>
    %33 = vector.extract_strided_slice %32 {offsets = [0, 0], sizes = [8, 2], strides = [1, 1]} : vector<8x128xf32> to vector<8x2xf32>
    %c0_8 = arith.constant 0 : index
    %c0_9 = arith.constant 0 : index
    %34 = vector.load %arg5[%c0_8, %c0_9] : memref<1x2xf32, #tpu.memory_space<vmem>>, vector<1x2xf32>
    %35 = vector.broadcast %34 : vector<1x2xf32> to vector<8x2xf32>
    %36 = arith.addf %33, %35 : vector<8x2xf32>
    %c0_10 = arith.constant 0 : index
    %c0_11 = arith.constant 0 : index
    %37 = vector.load %arg6[%c0_10, %c0_11] : memref<8x2xf32, #tpu.memory_space<vmem>>, vector<8x2xf32>
    tpu.vector_store %arg6[%c0_10, %c0_11], %36 {strides = array<i32>} : memref<8x2xf32, #tpu.memory_space<vmem>>, vector<8x2xf32>,
    return
  }
  func.func @transform_0(%arg0: i32) -> (i32, i32) {
    %c0_i32 = arith.constant 0 : i32
    %c0_i32_0 = arith.constant 0 : i32
    return %arg0, %c0_i32 : i32, i32
  }
  func.func @transform_1(%arg0: i32) -> (i32, i32) {
    %c0_i32 = arith.constant 0 : i32
    %c0_i32_0 = arith.constant 0 : i32
    %c0_i32_1 = arith.constant 0 : i32
    return %c0_i32, %c0_i32_0 : i32, i32
  }
  func.func @transform_2(%arg0: i32) -> (i32, i32) {
    %c0_i32 = arith.constant 0 : i32
    %c0_i32_0 = arith.constant 0 : i32
    %c0_i32_1 = arith.constant 0 : i32
    return %c0_i32, %c0_i32_0 : i32, i32
  }
  func.func @transform_3(%arg0: i32) -> (i32, i32) {
    %c0_i32 = arith.constant 0 : i32
    %c0_i32_0 = arith.constant 0 : i32
    %c0_i32_1 = arith.constant 0 : i32
    return %c0_i32, %c0_i32_0 : i32, i32
  }
  func.func @transform_4(%arg0: i32) -> (i32, i32) {
    %c0_i32 = arith.constant 0 : i32
    %c0_i32_0 = arith.constant 0 : i32
    %c0_i32_1 = arith.constant 0 : i32
    return %c0_i32, %c0_i32_0 : i32, i32
  }
  func.func @transform_5(%arg0: i32) -> (i32, i32) {
    %c0_i32 = arith.constant 0 : i32
    %c0_i32_0 = arith.constant 0 : i32
    return %arg0, %c0_i32 : i32, i32
  }
}

</mosaic_0001>

<bundles_post_ra>
// kernel: tpu_custom_call.1
= control target key start
LH: loop header
LB: loop body
LE: loop exit
PB: predicated region body
PF: predicated region fallthrough
CT: control target
= control target key end

     0   :  { %10 = vsyncpa [#allocation3], 0  ;;  %s391_s21 = smov [#allocation2]   ;;  %s392_s23 = smov 64   ;;  %s446_s0 = inlined_call_operand.vmem [shape: f32[8,4], index: 0, kind: input, shape index: {}]   ;;  %s447_s1 = inlined_call_operand.vmem [shape: f32[4,256], index: 1, kind: input, shape index: {}]   ;;  %s448_s2 = inlined_call_operand.vmem [shape: f32[1,256], index: 2, kind: input, shape index: {}]   ;;  %s449_s3 = inlined_call_operand.hbm [shape: bf16[256,128], index: 3, kind: input, shape index: {}]   ;;  %s450_s4 = inlined_call_operand.vmem [shape: f32[1,2], index: 4, kind: input, shape index: {}]   ;;  %s451_s5 = inlined_call_operand.vmem [shape: f32[8,2], index: 5, kind: output, shape index: {}]  }
   0x1   :  { %s21_s20 = sshll.u32 %s449_s3, 4  ;;  %s23_s22 = sshll.u32 %s391_s21, 4  ;;  %s22_s20 = int_to_ptr.hbm [resolvable:$true] %s21_s20  ;;  %s24_s22 = int_to_ptr.vmem [resolvable:$true] %s23_s22 }
   0x2   :  { %s393_s24 = smov 4  }
   0x3   :  { %29 = dma.hbm_to_vmem [thread:$0]  %s22_s20, 2048, %s24_s22, [#allocation3], %s392_s23, %s392_s23, %s393_s24  }
   0x4   :  { %389 = dma.done.wait [#allocation3], 2048  }
   0x5   :  { %390 = vsyncadd [#allocation3], 4294965248  ;;  %v394_v0 = vmov 0   ;;  %v395_v1 = vmov 2   ;;  %v36_v2 = vld [vmem:[%s446_s0] sm:$0xff]  ;;  %v343_v3 = vld [vmem:[#allocation2 + $0x38] sm:$0xff] }
   0x6   :  { %359 = vset.pattern.permute.xlu0 %v394_v0  ;;  %361 = vset.pattern.permute.xlu1 %v395_v1  ;;  %v351_v4 = vld [vmem:[#allocation2 + $0x78] sm:$0xff]  ;;  %v342_v5 = vld [vmem:[#allocation2 + $0x30] sm:$0xff]  ;;  %v396_v7 = vmov 1   ;;  %v397_v8 = vmov 3   ;;  %v341_v9 = vld [vmem:[#allocation2 + $0x28] sm:$0xff]  ;;  %vm265_vm0 = vcmask 15360  }
   0x7   :  { %40 = vperm.xlu0 %359, %v36_v2   ;;  %67 = vperm.xlu1 %361, %v36_v2   ;;  %v350_v6 = vld [vmem:[#allocation2 + $0x70] sm:$0xff]  ;;  %v349_v10 = vld [vmem:[#allocation2 + $0x68] sm:$0xff]  ;;  %v340_v11 = vld [vmem:[#allocation2 + $0x20] sm:$0xff] }
   0x8   :  { %234 = vmatpush.bf16.msra.mxu0 %v343_v3  ;;  %247 = vmatpush.bf16.msra.mxu1 %v351_v4  ;;  %v348_v12 = vld [vmem:[#allocation2 + $0x60] sm:$0xff]  ;;  %v339_v13 = vld [vmem:[#allocation2 + $0x18] sm:$0xff]  ;;  %v338_v15 = vld [vmem:[#allocation2 + $0x10] sm:$0xff] }
   0x9   :  { %v347_v14 = vld [vmem:[#allocation2 + $0x58] sm:$0xff]  ;;  %v346_v16 = vld [vmem:[#allocation2 + $0x50] sm:$0xff]  ;;  %v337_v17 = vld [vmem:[#allocation2 + $0x8] sm:$0xff] }
   0xa   :  { %v345_v18 = vld [vmem:[#allocation2 + $0x48] sm:$0xff]  ;;  %v336_v19 = vld [vmem:[#allocation2] sm:$0xff] }
   0xb   :  { %v344_v20 = vld [vmem:[#allocation2 + $0x40] sm:$0xff] }
   0xc   :  { %235 = vmatpush.bf16.msra.mxu0 %v342_v5  ;;  %248 = vmatpush.bf16.msra.mxu1 %v350_v6  ;;  %v37_v21 = vld [vmem:[%s447_s1] sm:$0xff] }
   0xd   :  { %v44_v24 = vperm.slane %v37_v21, 0  ;;  %v45_v25 = vperm.slane %v37_v21, 4  ;;  %v56_v26 = vperm.slane %v37_v21, 1  ;;  %v57_v27 = vperm.slane %v37_v21, 5  ;;  %v94_v48 = vld [vmem:[%s448_s2] sm:$0x3] }
   0xe   :  { %v70_v28 = vperm.slane %v37_v21, 2  ;;  %v71_v29 = vperm.slane %v37_v21, 6  ;;  %v84_v30 = vperm.slane %v37_v21, 3  ;;  %v85_v31 = vperm.slane %v37_v21, 7  ;;  %v364_v1 = vld [vmem:[%s450_s4] ss:$0 sm:$0xff] }
   0xf   :  { %360 = vset.pattern.permute.xlu0 %v396_v7  ;;  %362 = vset.pattern.permute.xlu1 %v397_v8  ;;  %v48_v32 = vperm.slane %v44_v24, 0  ;;  %v49_v33 = vperm.slane %v45_v25, 0  ;;  %v60_v34 = vperm.slane %v56_v26, 1  ;;  %v61_v35 = vperm.slane %v57_v27, 1 }
  0x10   :  { %53 = vperm.xlu0 %360, %v36_v2   ;;  %81 = vperm.xlu1 %362, %v36_v2   ;;  %v74_v36 = vperm.slane %v70_v28, 2  ;;  %v75_v37 = vperm.slane %v71_v29, 2  ;;  %v88_v38 = vperm.slane %v84_v30, 3  ;;  %v89_v39 = vperm.slane %v85_v31, 3 }
  0x11   :  { %236 = vmatpush.bf16.msra.mxu0 %v341_v9  ;;  %249 = vmatpush.bf16.msra.mxu1 %v349_v10  ;;  %v96_v55 = vperm.slane %v94_v48, 0  ;;  %v97_v56 = vperm.slane %v94_v48, 1 }
  0x15   :  { %237 = vmatpush.bf16.msra.mxu0 %v340_v11  ;;  %250 = vmatpush.bf16.msra.mxu1 %v348_v12 }
  0x18   :  { %363 = vset.pattern.permute.xlu0 %v397_v8 }
  0x19   :  { %238 = vmatpush.bf16.msra.mxu0 %v339_v13  ;;  %251 = vmatpush.bf16.msra.mxu1 %v347_v14 }
  0x1d   :  { %239 = vmatpush.bf16.msra.mxu0 %v338_v15  ;;  %252 = vmatpush.bf16.msra.mxu1 %v346_v16 }
  0x21   :  { %240 = vmatpush.bf16.msra.mxu0 %v337_v17  ;;  %253 = vmatpush.bf16.msra.mxu1 %v345_v18 }
  0x25   :  { %241 = vmatpush.bf16.msra.mxu0 %v336_v19  ;;  %254 = vmatpush.bf16.msra.mxu1 %v344_v20 }
  0x79   :  { %v41_v22 = vpop.permute.xlu0 %40  ;;  %v68_v23 = vpop.permute.xlu1 %67 }
  0x7a   :  { %v50_v42 = vmul.f32 %v48_v32, %v41_v22  ;;  %v51_v43 = vmul.f32 %v49_v33, %v41_v22  ;;  %v76_v46 = vmul.f32 %v74_v36, %v68_v23  ;;  %v77_v47 = vmul.f32 %v75_v37, %v68_v23 }
  0x82   :  { %v54_v40 = vpop.permute.xlu0 %53  ;;  %v82_v41 = vpop.permute.xlu1 %81 }
  0x83   :  { %v62_v44 = vmul.f32 %v60_v34, %v54_v40  ;;  %v63_v45 = vmul.f32 %v61_v35, %v54_v40  ;;  %v90_v51 = vmul.f32 %v88_v38, %v82_v41  ;;  %v91_v52 = vmul.f32 %v89_v39, %v82_v41 }
  0x85   :  { %v64_v49 = vadd.f32 %v62_v44, %v50_v42  ;;  %v65_v50 = vadd.f32 %v63_v45, %v51_v43 }
  0x87   :  { %v78_v53 = vadd.f32 %v76_v46, %v64_v49  ;;  %v79_v54 = vadd.f32 %v77_v47, %v65_v50 }
  0x89   :  { %v92_v57 = vadd.f32 %v90_v51, %v78_v53  ;;  %v93_v58 = vadd.f32 %v91_v52, %v79_v54 }
  0x8b   :  { %v100_v59 = vadd.f32 %v96_v55, %v92_v57  ;;  %v101_v60 = vadd.f32 %v97_v56, %v93_v58 }
  0x8d   :  { %v102_v61 = vmax.f32 %v100_v59, 0.0  ;;  %v103_v62 = vmax.f32 %v101_v60, 0.0 }
  0x8f   :  { %v104_v63 = vpack.c.bf16 %v102_v61, %v102_v61  ;;  %v105_v0 = vpack.c.bf16 %v103_v62, %v103_v62 }
  0x91   :  { %242 = vmatmul.bf16.vlgmr.msra.gmra.mxu0 %v104_v63  ;;  %255 = vmatmul.bf16.vlgmr.msra.gmra.mxu1 %v105_v0 }
 0x10e   :  { %v243_v2 = vpop.f32.mrf.mxu0  ;;  %v256_v3 = vpop.f32.mrf.mxu1 }
 0x10f   :  { %v257_v4 = vadd.f32 %v256_v3, %v243_v2 }
 0x111   :  { %v264_v5 = vadd.f32 %v364_v1, %v257_v4 }
 0x113   :  { %266 = vst.msk [vmem:[%s451_s5] sm:$0xff] %vm265_vm0, %v264_v5 }
 0x116   :  { %v245_v6 = vpop.f32.mrf.mxu0  ;;  %v258_v7 = vpop.f32.mrf.mxu1 }
 0x117   :  { %271 = vsyncpa [#allocation3], 1 }

</bundles_post_ra>
